<compile_context>
chip_gen: v7x
topology: tpu7x:2x2x1
jax: 0.10.0
libtpu: 0.0.40
codegen_flags: <defaults>
</compile_context>

<pallas_src>
import functools

import jax
import jax.numpy as jnp
from jax.experimental import pallas as pl
from jax.experimental.pallas import tpu as pltpu


def _round_up(n, m):
    return ((n + m - 1) // m) * m


def _default_bf16_silu():
    """bf16 VPU/EUP exist on v6e/v7x; keep f32 activation math on v5e and older."""
    try:
        kind = jax.devices()[0].device_kind.lower()
    except Exception:
        return False
    for tag in ("v2", "v3", "v4", "v5"):
        if tag in kind:
            return False
    return True


def _vmem_cap_bytes():
    """Generation-aware VMEM ceiling with headroom for Mosaic internal scratch."""
    try:
        cap = int(pltpu.get_tpu_info().vmem_capacity_bytes)
    except Exception:
        cap = 64 * 1024 * 1024          # conservative (v7x-sized) fallback
    return int(0.75 * cap)              # ~48 MiB on v7x, ~96 MiB on v5e/v6e


def _vmem_estimate(tile, dim_in, hp, dim_out, out_bytes):
    x_tile = tile * dim_in * 2                      # bf16 input tile
    o_tile = dim_out * tile * out_bytes             # transposed output tile
    weights = (dim_in * hp + hp * hp + hp * dim_out) * 2   # bf16, VMEM-resident
    biases = (2 * hp + dim_out) * 4                 # f32
    live = 3 * tile * hp * 4                        # f32 h + bf16 copy + matmul partials
    return 2 * (x_tile + o_tile) + 2 * (weights + biases) + live


def mlp_kernel(x_ref, w0_ref, b0_ref, w1_ref, b1_ref, w2t_ref, b2t_ref, o_ref,
               *, silu_bf16):
    # Layer 0: Linear(dim_in -> hidden_pad) + SiLU. bf16 MXU operands, f32 accumulate.
    h = jnp.dot(x_ref[...], w0_ref[...], preferred_element_type=jnp.float32)
    h = h + b0_ref[...]
    if silu_bf16:                                   # v6e/v7x: bf16 VPU + EUP
        h = h.astype(jnp.bfloat16)
        h = h * jax.nn.sigmoid(h)
    else:                                           # v5e: f32 SiLU, cast for the MXU
        h = h * jax.nn.sigmoid(h)
        h = h.astype(jnp.bfloat16)

    # Layer 1: Linear(hidden_pad -> hidden_pad) + SiLU.
    h = jnp.dot(h, w1_ref[...], preferred_element_type=jnp.float32)
    h = h + b1_ref[...]
    if silu_bf16:
        h = h.astype(jnp.bfloat16)
        h = h * jax.nn.sigmoid(h)
    else:
        h = h * jax.nn.sigmoid(h)
        h = h.astype(jnp.bfloat16)

    # Layer 2, computed transposed so the store is lane-dense:
    #   out_T[o, n] = sum_d W2T[o, d] * h[n, d]   -> shape (dim_out, tile)
    out_t = jax.lax.dot_general(
        w2t_ref[...], h,
        dimension_numbers=(((1,), (1,)), ((), ())),
        preferred_element_type=jnp.float32)
    o_ref[...] = (out_t + b2t_ref[...]).astype(o_ref.dtype)


def mlp_pallas(x, params, *, tile_m=8192, lane=128, silu_bf16=None,
               out_dtype=jnp.float32):
    """Fused MLP forward.

    x: (N, dim_in). params: dict w0/b0/w1/b1/w2/b2 with weights stored as
    (in_features, out_features), so the math is x @ W + b. Returns (N, dim_out).
    """
    if silu_bf16 is None:
        silu_bf16 = _default_bf16_silu()

    N, dim_in = x.shape
    w0, b0 = params["w0"], params["b0"]
    w1, b1 = params["w1"], params["b1"]
    w2, b2 = params["w2"], params["b2"]
    hidden = w0.shape[1]
    dim_out = w2.shape[1]

    # Weight prep: pad hidden to a multiple of 128 lanes; bf16 MXU operands.
    # SiLU(0) = 0 and zero weight rows/cols keep the padded lanes exactly zero.
    hp = _round_up(hidden, lane)
    ph = hp - hidden
    w0p = jnp.pad(w0, ((0, 0), (0, ph))).astype(jnp.bfloat16)          # (dim_in, hp)
    b0p = jnp.pad(b0, ((0, 0), (0, ph))).astype(jnp.float32)           # (1, hp)
    w1p = jnp.pad(w1, ((0, ph), (0, ph))).astype(jnp.bfloat16)         # (hp, hp)
    b1p = jnp.pad(b1, ((0, 0), (0, ph))).astype(jnp.float32)           # (1, hp)
    w2tp = jnp.pad(w2, ((0, ph), (0, 0))).astype(jnp.bfloat16).T       # (dim_out, hp)
    b2tp = b2.reshape(dim_out, 1).astype(jnp.float32)                  # (dim_out, 1)

    # Row tiling. Tiles are multiples of 128 because the transposed output puts the
    # row axis on lanes. Cap the tile at ~N/2 so v7x's two TensorCores both get work.
    out_bytes = jnp.dtype(out_dtype).itemsize
    tile = max(lane, _round_up(int(tile_m), lane))
    two_core_tile = _round_up(-(-N // 2), lane)
    tile = min(tile, two_core_tile)

    cap = _vmem_cap_bytes()
    margin = 8 * 1024 * 1024
    while _vmem_estimate(tile, dim_in, hp, dim_out, out_bytes) + margin > cap and tile > lane:
        tile = max(lane, _round_up(tile // 2, lane))

    n_pad = _round_up(N, tile)
    grid = (n_pad // tile,)

    # Single wrapper op: cast (subsumes torch's x.float(): MXU operands are bf16) + pad.
    xb = x.astype(jnp.bfloat16)
    if n_pad != N:
        xb = jnp.pad(xb, ((0, n_pad - N), (0, 0)))

    est = _vmem_estimate(tile, dim_in, hp, dim_out, out_bytes)
    vmem_limit = int(min(max(est + margin, 32 * 1024 * 1024), cap))

    res = lambda shape: pl.BlockSpec(shape, lambda i: (0,) * len(shape))

    out_t = pl.pallas_call(
        functools.partial(mlp_kernel, silu_bf16=bool(silu_bf16)),
        out_shape=jax.ShapeDtypeStruct((dim_out, n_pad), out_dtype),
        grid=grid,
        in_specs=[
            pl.BlockSpec((tile, dim_in), lambda i: (i, 0)),   # x: row tiled
            res((dim_in, hp)), res((1, hp)),                  # W0, b0 (VMEM-resident)
            res((hp, hp)), res((1, hp)),                      # W1, b1
            res((dim_out, hp)), res((dim_out, 1)),            # W2^T, b2^T
        ],
        # Lane-dense, unmasked stores: row axis of the output lives on the 128 lanes.
        out_specs=pl.BlockSpec((dim_out, tile), lambda i: (0, i)),
        compiler_params=pltpu.CompilerParams(
            dimension_semantics=("parallel",),
            vmem_limit_bytes=vmem_limit,
        ),
    )(xb, w0p, b0p, w1p, b1p, w2tp, b2tp)

    # Consume transposed wrapper-side: drop row padding, restore (N, dim_out).
    return out_t[:, :N].T


def init_mlp_params(key, dim_in, dim_out, expansion_factor=2.0, depth=2):
    """Deterministic synthetic init. Weights stored as (in_features, out_features)."""
    assert depth == 2, "script instantiates the default depth=2 configuration"
    hidden = int(expansion_factor * dim_out)
    keys = jax.random.split(key, 6)
    scale = 0.1
    return {
        "w0": scale * jax.random.normal(keys[0], (dim_in, hidden), jnp.float32),
        "b0": scale * jax.random.normal(keys[1], (1, hidden), jnp.float32),
        "w1": scale * jax.random.normal(keys[2], (hidden, hidden), jnp.float32),
        "b1": scale * jax.random.normal(keys[3], (1, hidden), jnp.float32),
        "w2": scale * jax.random.normal(keys[4], (hidden, dim_out), jnp.float32),
        "b2": scale * jax.random.normal(keys[5], (1, dim_out), jnp.float32),
    }


def mlp_reference(x, params):
    """Pure-JAX f32 reference matching the PyTorch forward."""
    x = x.astype(jnp.float32)
    h = x @ params["w0"] + params["b0"]
    h = h * jax.nn.sigmoid(h)
    h = h @ params["w1"] + params["b1"]
    h = h * jax.nn.sigmoid(h)
    return h @ params["w2"] + params["b2"]


if __name__ == "__main__":
    key = jax.random.PRNGKey(0)
    kx, kp = jax.random.split(key)

    dim_in, dim_out = 16, 32        # hidden = int(2.0 * 32) = 64, padded to 128 in-kernel
    N = 300                         # deliberately not a multiple of 8 or 128

    x = jax.random.normal(kx, (N, dim_in), jnp.float32)
    params = init_mlp_params(kp, dim_in, dim_out)
    y_ref = mlp_reference(x, params)

    # Default config: tile capped at ~cdiv(N,2) -> 2 grid steps (v7x 2-TC friendly).
    y = jax.block_until_ready(mlp_pallas(x, params))
    # Small tile: 3-step grid with zero-padded remainder rows (exercises pipelining).
    y_tiled = jax.block_until_ready(mlp_pallas(x, params, tile_m=128))
    # Explicit f32-SiLU path (what v5e uses).
    y_f32act = jax.block_until_ready(mlp_pallas(x, params, silu_bf16=False))

    assert y.shape == (N, dim_out) and y_tiled.shape == (N, dim_out)
    # bf16 MXU operands (and bf16 SiLU on v6e/v7x) => looser tolerance vs f32 reference.
    assert jnp.allclose(y, y_ref, atol=2e-2, rtol=2e-2), "mismatch vs reference"
    assert jnp.allclose(y_tiled, y_ref, atol=2e-2, rtol=2e-2), "tiled mismatch vs reference"
    assert jnp.allclose(y_f32act, y_ref, atol=2e-2, rtol=2e-2), "f32-SiLU mismatch vs reference"
    assert jnp.allclose(y, y_tiled, atol=1e-4, rtol=1e-4), "tiling changed results"

    print("KERNEL_OK")
</pallas_src>

<mosaic_0001>
module attributes {stable_mosaic.version = 11 : i64} {
  func.func @mlp_kernel(%arg0: i32, %arg1: memref<256x16xbf16, #tpu.memory_space<vmem>>, %arg2: memref<16x128xbf16, #tpu.memory_space<vmem>>, %arg3: memref<1x128xf32, #tpu.memory_space<vmem>>, %arg4: memref<128x128xbf16, #tpu.memory_space<vmem>>, %arg5: memref<1x128xf32, #tpu.memory_space<vmem>>, %arg6: memref<32x128xbf16, #tpu.memory_space<vmem>>, %arg7: memref<32x1xf32, #tpu.memory_space<vmem>>, %arg8: memref<32x256xf32, #tpu.memory_space<vmem>>) attributes {dimension_semantics = [#tpu.dimension_semantics<parallel>], iteration_bounds = array<i64: 2>, scalar_prefetch = 0 : i64, scratch_operands = 0 : i64, tpu.core_type = #tpu.core_type<tc>, window_params = [{transform_indices = @transform_0, window_bounds = array<i64: 256, 16>}, {pipeline_mode = #tpu.pipeline_mode<synchronous>, transform_indices = @transform_1, window_bounds = array<i64: 16, 128>}, {pipeline_mode = #tpu.pipeline_mode<synchronous>, transform_indices = @transform_2, window_bounds = array<i64: 1, 128>}, {pipeline_mode = #tpu.pipeline_mode<synchronous>, transform_indices = @transform_3, window_bounds = array<i64: 128, 128>}, {pipeline_mode = #tpu.pipeline_mode<synchronous>, transform_indices = @transform_4, window_bounds = array<i64: 1, 128>}, {pipeline_mode = #tpu.pipeline_mode<synchronous>, transform_indices = @transform_5, window_bounds = array<i64: 32, 128>}, {pipeline_mode = #tpu.pipeline_mode<synchronous>, transform_indices = @transform_6, window_bounds = array<i64: 32, 1>}, {transform_indices = @transform_7, window_bounds = array<i64: 32, 256>}]} {
    %c0 = arith.constant 0 : index
    %c0_0 = arith.constant 0 : index
    %0 = vector.load %arg1[%c0, %c0_0] : memref<256x16xbf16, #tpu.memory_space<vmem>>, vector<256x16xbf16>
    %c0_1 = arith.constant 0 : index
    %c0_2 = arith.constant 0 : index
    %1 = vector.load %arg2[%c0_1, %c0_2] : memref<16x128xbf16, #tpu.memory_space<vmem>>, vector<16x128xbf16>
    %cst = arith.constant dense<0.000000e+00> : vector<256x128xf32>
    %2 = tpu.matmul %0, %1, %cst {dimension_numbers = #tpu.dot_dimension_numbers<[1], [0], [0], [1], [0, 0, 1, 1], [], []>} : vector<256x16xbf16>, vector<16x128xbf16>, vector<256x128xf32> -> vector<256x128xf32>
    %c0_3 = arith.constant 0 : index
    %c0_4 = arith.constant 0 : index
    %3 = vector.load %arg3[%c0_3, %c0_4] : memref<1x128xf32, #tpu.memory_space<vmem>>, vector<1x128xf32>
    %4 = vector.broadcast %3 : vector<1x128xf32> to vector<256x128xf32>
    %5 = arith.addf %2, %4 : vector<256x128xf32>
    %6 = arith.truncf %5 : vector<256x128xf32> to vector<256x128xbf16>
    %7 = arith.negf %6 : vector<256x128xbf16>
    %8 = math.exp %7 : vector<256x128xbf16>
    %cst_5 = arith.constant 1.000000e+00 : bf16
    %9 = vector.broadcast %cst_5 : bf16 to vector<256x128xbf16>
    %10 = arith.addf %9, %8 : vector<256x128xbf16>
    %11 = arith.divf %9, %10 : vector<256x128xbf16>
    %12 = arith.mulf %6, %11 : vector<256x128xbf16>
    %c0_6 = arith.constant 0 : index
    %c0_7 = arith.constant 0 : index
    %13 = vector.load %arg4[%c0_6, %c0_7] : memref<128x128xbf16, #tpu.memory_space<vmem>>, vector<128x128xbf16>
    %cst_8 = arith.constant dense<0.000000e+00> : vector<256x128xf32>
    %14 = tpu.matmul %12, %13, %cst_8 {dimension_numbers = #tpu.dot_dimension_numbers<[1], [0], [0], [1], [0, 0, 1, 1], [], []>} : vector<256x128xbf16>, vector<128x128xbf16>, vector<256x128xf32> -> vector<256x128xf32>
    %c0_9 = arith.constant 0 : index
    %c0_10 = arith.constant 0 : index
    %15 = vector.load %arg5[%c0_9, %c0_10] : memref<1x128xf32, #tpu.memory_space<vmem>>, vector<1x128xf32>
    %16 = vector.broadcast %15 : vector<1x128xf32> to vector<256x128xf32>
    %17 = arith.addf %14, %16 : vector<256x128xf32>
    %18 = arith.truncf %17 : vector<256x128xf32> to vector<256x128xbf16>
    %19 = arith.negf %18 : vector<256x128xbf16>
    %20 = math.exp %19 : vector<256x128xbf16>
    %cst_11 = arith.constant 1.000000e+00 : bf16
    %21 = vector.broadcast %cst_11 : bf16 to vector<256x128xbf16>
    %22 = arith.addf %21, %20 : vector<256x128xbf16>
    %23 = arith.divf %21, %22 : vector<256x128xbf16>
    %24 = arith.mulf %18, %23 : vector<256x128xbf16>
    %c0_12 = arith.constant 0 : index
    %c0_13 = arith.constant 0 : index
    %25 = vector.load %arg6[%c0_12, %c0_13] : memref<32x128xbf16, #tpu.memory_space<vmem>>, vector<32x128xbf16>
    %cst_14 = arith.constant dense<0.000000e+00> : vector<32x256xf32>
    %26 = tpu.matmul %25, %24, %cst_14 {dimension_numbers = #tpu.dot_dimension_numbers<[1], [1], [0], [0], [0, 0, 1, 0], [], []>} : vector<32x128xbf16>, vector<256x128xbf16>, vector<32x256xf32> -> vector<32x256xf32>
    %c0_15 = arith.constant 0 : index
    %c0_16 = arith.constant 0 : index
    %27 = vector.load %arg7[%c0_15, %c0_16] : memref<32x1xf32, #tpu.memory_space<vmem>>, vector<32x1xf32>
    %28 = vector.broadcast %27 : vector<32x1xf32> to vector<32x256xf32>
    %29 = arith.addf %26, %28 : vector<32x256xf32>
    %c0_17 = arith.constant 0 : index
    %c0_18 = arith.constant 0 : index
    %30 = vector.load %arg8[%c0_17, %c0_18] : memref<32x256xf32, #tpu.memory_space<vmem>>, vector<32x256xf32>
    tpu.vector_store %arg8[%c0_17, %c0_18], %29 {strides = array<i32>} : memref<32x256xf32, #tpu.memory_space<vmem>>, vector<32x256xf32>,
    return
  }
  func.func @transform_0(%arg0: i32) -> (i32, i32) {
    %c0_i32 = arith.constant 0 : i32
    %c0_i32_0 = arith.constant 0 : i32
    return %arg0, %c0_i32 : i32, i32
  }
  func.func @transform_1(%arg0: i32) -> (i32, i32) {
    %c0_i32 = arith.constant 0 : i32
    %c0_i32_0 = arith.constant 0 : i32
    %c0_i32_1 = arith.constant 0 : i32
    return %c0_i32, %c0_i32_0 : i32, i32
  }
  func.func @transform_2(%arg0: i32) -> (i32, i32) {
    %c0_i32 = arith.constant 0 : i32
    %c0_i32_0 = arith.constant 0 : i32
    %c0_i32_1 = arith.constant 0 : i32
    return %c0_i32, %c0_i32_0 : i32, i32
  }
  func.func @transform_3(%arg0: i32) -> (i32, i32) {
    %c0_i32 = arith.constant 0 : i32
    %c0_i32_0 = arith.constant 0 : i32
    %c0_i32_1 = arith.constant 0 : i32
    return %c0_i32, %c0_i32_0 : i32, i32
  }
  func.func @transform_4(%arg0: i32) -> (i32, i32) {
    %c0_i32 = arith.constant 0 : i32
    %c0_i32_0 = arith.constant 0 : i32
    %c0_i32_1 = arith.constant 0 : i32
    return %c0_i32, %c0_i32_0 : i32, i32
  }
  func.func @transform_5(%arg0: i32) -> (i32, i32) {
    %c0_i32 = arith.constant 0 : i32
    %c0_i32_0 = arith.constant 0 : i32
    %c0_i32_1 = arith.constant 0 : i32
    return %c0_i32, %c0_i32_0 : i32, i32
  }
  func.func @transform_6(%arg0: i32) -> (i32, i32) {
    %c0_i32 = arith.constant 0 : i32
    %c0_i32_0 = arith.constant 0 : i32
    %c0_i32_1 = arith.constant 0 : i32
    return %c0_i32, %c0_i32_0 : i32, i32
  }
  func.func @transform_7(%arg0: i32) -> (i32, i32) {
    %c0_i32 = arith.constant 0 : i32
    %c0_i32_0 = arith.constant 0 : i32
    return %c0_i32, %arg0 : i32, i32
  }
}

</mosaic_0001>

<bundles_post_ra>
// kernel: tpu_custom_call.1
= control target key start
LH: loop header
LB: loop body
LE: loop exit
PB: predicated region body
PF: predicated region fallthrough
CT: control target
= control target key end

     0   :  { %12 = vsyncpa [#allocation3], 0  ;;  %s2241_s0 = inlined_call_operand.vmem [shape: bf16[512,16], index: 0, kind: input, shape index: {}]   ;;  %s2242_s1 = inlined_call_operand.vmem [shape: bf16[16,128], index: 1, kind: input, shape index: {}]   ;;  %s2243_s2 = inlined_call_operand.vmem [shape: f32[1,128], index: 2, kind: input, shape index: {}]   ;;  %s2244_s3 = inlined_call_operand.vmem [shape: bf16[128,128], index: 3, kind: input, shape index: {}]   ;;  %s2245_s4 = inlined_call_operand.vmem [shape: f32[1,128], index: 4, kind: input, shape index: {}]   ;;  %s2246_s5 = inlined_call_operand.vmem [shape: bf16[32,128], index: 5, kind: input, shape index: {}]   ;;  %s2247_s6 = inlined_call_operand.vmem [shape: f32[32,1], index: 6, kind: input, shape index: {}]   ;;  %s2248_s7 = inlined_call_operand.hbm [shape: f32[32,512], index: 7, kind: output, shape index: {}]  }
   0x1   :  { %14 = vsyncpa [#allocation3 + $0x1], 0  ;;  %s1858_s24 = smov 0   ;;  %s1860_s25 = smov 0  }
   0x2   :  { %s1862_s26 = smov 0   ;;  %s1864_s27 = smov 0  }
   0x3 LB: > { %s1879_s28 = sadd.s32 4294967295, %s1811_s27   ;;  %s1316_s29 = sadd.s32 4294967294, %s1811_s27   ;;  %s1811_s27 = sphi %s1864_s27, %s2254_s27   ;;  %s1807_s26 = sphi %s1862_s26, %s2253_s26   ;;  %s1803_s25 = sphi %s1860_s25, %s2252_s25   ;;  %s1799_s24 = sphi %s1858_s24, %s2251_s24  }
   0x4   : > { %s1883_s30 = sadd.s32 1, %s1811_s27   ;;  %s179_s8 = sadd.s32 1, %s1807_s26 }
   0x5   : > { %s176_s9 = ssub.s32 %s1811_s27, %s1883_s30  ;;  %p189_p0 = scmp.ne.s32.totalorder %s1807_s26, %s1803_s25 }
   0x6   : > { %p177_p1 = scmp.eq.s32.totalorder %s176_s9, 0  ;;  %p190_p2 = scmp.eq.s32.totalorder %s1879_s28, 1 }
   0x7   : > { %p195_p3 = scmp.ne.s32.totalorder %s1803_s25, %s1799_s24  ;;  %p196_p4 = scmp.eq.s32.totalorder %s1316_s29, 1 }
   0x8   : > { %s1894_s10 = scalar_select %p177_p1, %s1807_s26, %s179_s8  }
   0x9   : > { %p1896_p5 = por %p190_p2, %p189_p0  ;;  %p1900_p6 = por %p196_p4, %p195_p3 }
   0xa   : > { %p1319_p7 = scmp.ge.s32.totalorder %s1811_s27, 1  ;;  %p241_p8 = scmp.lt.s32.totalorder %s1811_s27, 3 }
   0xc   : > { %p242_p9 = pnand %p1319_p7, %p241_p8 }
   0xd   : > { %v1594_v0 = vld [vmem:[%s2242_s1] sm:$0xff] (!%p242_p9)   ;;  %s1321_s15 = sshll.u32 (!%p242_p9), %s1879_s28, 5  ;;  %vm409_vm0 = vcmask (!%p242_p9), 130048   ;;  %v1612_v18 = vld [vmem:[%s2244_s3 + $0x8] sm:$0xff] (!%p242_p9)   ;;  %v1613_v19 = vld [vmem:[%s2244_s3 + $0x10] sm:$0xff] (!%p242_p9)   ;;  %s270_s29 = sand.u32 (!%p242_p9), 1, %s1803_s25  }
   0xe   : > { %245 = sbr.rel (%p242_p9) target bundleno = 866 (0x362), region = 48  ;;  %p274_p10 = scmp.lt.s32.totalorder (!%p242_p9), %s1321_s15, 63  ;;  %1467 = vmatprep.subr.bf16.mxu0 (!%p242_p9), %v1594_v0  ;;  %v1611_v17 = vld [vmem:[%s2244_s3] sm:$0xff] (!%p242_p9)   ;;  %v1614_v20 = vld [vmem:[%s2244_s3 + $0x18] sm:$0xff] (!%p242_p9)   ;;  %v1616_v22 = vld [vmem:[%s2244_s3 + $0x28] sm:$0xff] (!%p242_p9)  }
   0xf   : > { %1468 = vmatpush3.bf16.msra.mxu0 (!%p242_p9), %v1594_v0  ;;  %1501 = vmatprep.subr.bf16.mxu1 (!%p242_p9), %v1611_v17  ;;  %v1615_v21 = vld [vmem:[%s2244_s3 + $0x20] sm:$0xff] (!%p242_p9)   ;;  %v1617_v23 = vld [vmem:[%s2244_s3 + $0x30] sm:$0xff] (!%p242_p9)   ;;  %v1618_v24 = vld [vmem:[%s2244_s3 + $0x38] sm:$0xff] (!%p242_p9)   ;;  %s1320_s8 = sshll.u32 (!%p242_p9), %s270_s29, 6  ;;  %s1405_s14 = sshll.u32 (!%p242_p9), %s1879_s28, 8 }
  0x10   : > { %1502 = vmatpush3.bf16.msra.mxu1 (!%p242_p9), %v1611_v17  ;;  %v1974_v26 = vld [vmem:[%s2243_s2] ss:$0 sm:$0xff] (!%p242_p9)  ;;  %s272_s9 = scalar_lea.vmem (!%p242_p9), [#allocation2], %s1320_s8  ;;  %s2196_s17 = scalar_lea.hbm (!%p242_p9), %s2248_s7, %s1405_s14 }
  0x11   : > { %1503 = vmatprep.subr.bf16.mxu1 (!%p242_p9), %v1612_v18  ;;  %s1254_s13 = sshll.u32 (!%p242_p9), %s272_s9, 4  ;;  %s2200_s28 = scalar_lea.sflag (!%p242_p9), [#allocation3], %s270_s29  ;;  %s2191_s13 = int_to_ptr.vmem [resolvable:$true] %s1254_s13 }
  0x12   : > { %s1749_s18 = scalar_lea.vmem (!%p242_p9), %s2191_s13, 1024 }
  0x13   : > { %p1750_p11 = scmp.ne.s32.totalorder (!%p242_p9), %s2191_s13, %s1749_s18 }
  0x14   : > { %1504 = vmatpush3.bf16.msra.mxu1 (!%p242_p9), %v1612_v18 }
  0x15   : > { %s2256_s15 = smov (!%p274_p10, %s1321_s15), 63  ;;  %1505 = vmatprep.subr.bf16.mxu1 %v1613_v19  ;;  %p1751_p12 = pnand %p1750_p11, %p1896_p5 }
  0x16   : > { %s1322_s16 = sshll.u32 %s2256_s15, 2 }
  0x17   : > { %s1913_s19 = scalar_lea.vmem %s2241_s0, %s1322_s16  ;;  %p1752_p13 = pneg %p1751_p12 }
  0x18   : > { %v1595_v1 = vld [vmem:[%s1913_s19] sm:$0xff]   ;;  %v1596_v2 = vld [vmem:[%s1913_s19 + $0x8] sm:$0xff]   ;;  %v1597_v3 = vld [vmem:[%s1913_s19 + $0x10] sm:$0xff]   ;;  %1506 = vmatpush3.bf16.msra.mxu1 %v1613_v19 }
  0x19   : > { %1469 = vmatprep.mubr.msk.bf16.mxu0 %vm409_vm0, %v1595_v1  ;;  %v1598_v4 = vld [vmem:[%s1913_s19 + $0x18] sm:$0xff]   ;;  %v1599_v5 = vld [vmem:[%s1913_s19 + $0x20] sm:$0xff]   ;;  %v1600_v6 = vld [vmem:[%s1913_s19 + $0x28] sm:$0xff]   ;;  %1507 = vmatprep.subr.bf16.mxu1 %v1614_v20 }
  0x1a   : > { %1470 = vmatmul.mubr.msk.bf16.vlgmr.msra.gmra.mrb[0].mxu0 %vm409_vm0, %v1596_v2  ;;  %v1601_v7 = vld [vmem:[%s1913_s19 + $0x30] sm:$0xff]   ;;  %v1602_v8 = vld [vmem:[%s1913_s19 + $0x38] sm:$0xff]   ;;  %v1603_v9 = vld [vmem:[%s1913_s19 + $0x40] sm:$0xff]  }
  0x1b   : > { %1473 = vmatprep.mubr.msk.bf16.mxu0 %vm409_vm0, %v1597_v3  ;;  %v1604_v10 = vld [vmem:[%s1913_s19 + $0x48] sm:$0xff]   ;;  %v1605_v11 = vld [vmem:[%s1913_s19 + $0x50] sm:$0xff]   ;;  %v1606_v12 = vld [vmem:[%s1913_s19 + $0x58] sm:$0xff]  }
  0x1c   : > { %v1607_v13 = vld [vmem:[%s1913_s19 + $0x60] sm:$0xff]   ;;  %v1608_v14 = vld [vmem:[%s1913_s19 + $0x68] sm:$0xff]   ;;  %v1609_v15 = vld [vmem:[%s1913_s19 + $0x70] sm:$0xff]   ;;  %1508 = vmatpush3.bf16.msra.mxu1 %v1614_v20 }
  0x1d   : > { %v1610_v16 = vld [vmem:[%s1913_s19 + $0x78] sm:$0xff]   ;;  %1509 = vmatprep.subr.bf16.mxu1 %v1615_v21  ;;  %s1814_s19 = smov [#allocation2]  }
  0x1e   : > { %s1753_s20 = sshll.u32 %s1814_s19, 4  ;;  %s1754_s20 = int_to_ptr.vmem [resolvable:$false] %s1753_s20 }
  0x1f   : > { %s1755_s21 = scalar_lea.vmem %s1754_s20, 2048  ;;  %p1756_p0 = scmp.lt.s32.totalorder %s2191_s13, %s1754_s20 }
  0x20   : > { %1510 = vmatpush3.bf16.msra.mxu1 %v1615_v21  ;;  %p1757_p1 = scmp.lt.s32.totalorder %s1755_s21, %s1749_s18 }
  0x21   : > { %1511 = vmatprep.subr.bf16.mxu1 %v1616_v22 }
  0x22   : > { %1474 = vmatmul.mubr.msk.bf16.gmra.mrb[4].mxu0 %vm409_vm0, %v1598_v4  ;;  %p1758_p2 = por %p1757_p1, %p1756_p0 }
  0x23   : > { %1477 = vmatprep.mubr.msk.bf16.mxu0 %vm409_vm0, %v1599_v5 }
  0x24   : > { %1512 = vmatpush3.bf16.msra.mxu1 %v1616_v22  ;;  %p1759_p3 = pnand %p1758_p2, %p1752_p13 }
  0x25   : > { %1513 = vmatprep.subr.bf16.mxu1 %v1617_v23 }
  0x28   : > { %1514 = vmatpush3.bf16.msra.mxu1 %v1617_v23 }
  0x29   : > { %1515 = vmatprep.subr.bf16.mxu1 %v1618_v24 }
  0x2a   : > { %1478 = vmatmul.mubr.msk.bf16.gmra.mrb[8].mxu0 %vm409_vm0, %v1600_v6 }
  0x2b   : > { %1481 = vmatprep.mubr.msk.bf16.mxu0 %vm409_vm0, %v1601_v7 }
  0x2c   : > { %1516 = vmatpush3.bf16.msra.mxu1 %v1618_v24 }
  0x32   : > { %1482 = vmatmul.mubr.msk.bf16.gmra.mrb[12].mxu0 %vm409_vm0, %v1602_v8 }
  0x33   : > { %1485 = vmatprep.mubr.msk.bf16.mxu0 %vm409_vm0, %v1603_v9 }
  0x3a   : > { %1486 = vmatmul.mubr.msk.bf16.gmra.mrb[16].mxu0 %vm409_vm0, %v1604_v10 }
  0x3b   : > { %1489 = vmatprep.mubr.msk.bf16.mxu0 %vm409_vm0, %v1605_v11 }
  0x42   : > { %1490 = vmatmul.mubr.msk.bf16.gmra.mrb[20].mxu0 %vm409_vm0, %v1606_v12 }
  0x43   : > { %1493 = vmatprep.mubr.msk.bf16.mxu0 %vm409_vm0, %v1607_v13 }
  0x4a   : > { %1494 = vmatmul.mubr.msk.bf16.gmra.mrb[24].mxu0 %vm409_vm0, %v1608_v14 }
  0x4b   : > { %1497 = vmatprep.mubr.msk.bf16.mxu0 %vm409_vm0, %v1609_v15 }
  0x52   : > { %1498 = vmatmul.mubr.msk.bf16.gmra.mrb[28].mxu0 %vm409_vm0, %v1610_v16 }
  0xed   : > { %v1471_v25 = vpop.f32.mrb[0].mxu0 }
  0xee   : > { %v492_v27 = vpop.f32.mrb[1].mxu0  ;;  %v501_v29 = vadd.f32 %v1471_v25, %v1974_v26 }
  0xef   : > { %v1472_v28 = vpop.f32.mrb[2].mxu0  ;;  %v493_v32 = vadd.f32 %v1974_v26, %v492_v27 }
  0xf0   : > { %v504_v30 = vadd.f32 %v1472_v28, %v1974_v26  ;;  %v495_v31 = vpop.f32.mrb[3].mxu0 }
  0xf1   : > { %v496_v33 = vadd.f32 %v1974_v26, %v495_v31 }
  0xf2   : > { %v1980_v34 = vpack.c.bf16 %v504_v30, %v501_v29 }
  0xf3   : > { %v1982_v35 = vpack.c.bf16 %v496_v33, %v493_v32 }
  0xf4   : > { %v1358_v36 = vmul.bf16 3216621497, %v1980_v34 }
  0xf5   : > { %v1475_v37 = vpop.f32.mrb[4].mxu0  ;;  %v1357_v38 = vmul.bf16 3216621497, %v1982_v35 }
  0xf6   : > { %1621 = vpow.bf16 %v1358_v36  ;;  %v508_v39 = vpop.f32.mrb[5].mxu0  ;;  %v517_v41 = vadd.f32 %v1475_v37, %v1974_v26 }
  0xf7   : > { %v1476_v40 = vpop.f32.mrb[6].mxu0  ;;  %1623 = vpow.bf16 %v1357_v38  ;;  %v509_v44 = vadd.f32 %v1974_v26, %v508_v39 }
  0xf8   : > { %v520_v42 = vadd.f32 %v1476_v40, %v1974_v26  ;;  %v511_v43 = vpop.f32.mrb[7].mxu0 }
  0xf9   : > { %v512_v45 = vadd.f32 %v1974_v26, %v511_v43 }
  0xfa   : > { %v1990_v46 = vpack.c.bf16 %v520_v42, %v517_v41 }
  0xfb   : > { %v1992_v47 = vpack.c.bf16 %v512_v45, %v509_v44 }
  0xfc   : > { %v1360_v48 = vmul.bf16 3216621497, %v1990_v46 }
  0xfd   : > { %v1359_v49 = vmul.bf16 3216621497, %v1992_v47  ;;  %v1479_v50 = vpop.f32.mrb[8].mxu0 }
  0xfe   : > { %1625 = vpow.bf16 %v1360_v48  ;;  %v524_v51 = vpop.f32.mrb[9].mxu0  ;;  %v533_v53 = vadd.f32 %v1479_v50, %v1974_v26 }
  0xff   : > { %1627 = vpow.bf16 %v1359_v49  ;;  %v1480_v52 = vpop.f32.mrb[10].mxu0  ;;  %v525_v57 = vadd.f32 %v1974_v26, %v524_v51 }
 0x100   : > { %v536_v54 = vadd.f32 %v1480_v52, %v1974_v26  ;;  %v527_v55 = vpop.f32.mrb[11].mxu0 }
 0x101   : > { %v1622_v56 = vpop.eup %1621  ;;  %v528_v58 = vadd.f32 %v1974_v26, %v527_v55 }
 0x102   : > { %v1624_v59 = vpop.eup %1623  ;;  %v700_v60 = vadd.bf16 1065369472, %v1622_v56  ;;  %v2000_v61 = vpack.c.bf16 %v536_v54, %v533_v53 }
 0x103   : > { %v2002_v62 = vpack.c.bf16 %v528_v58, %v525_v57  ;;  %v699_v63 = vadd.bf16 1065369472, %v1624_v59 }
 0x104   : > { %1629 = vrcp.bf16 %v700_v60  ;;  %v1362_v0 = vmul.bf16 3216621497, %v2000_v61 }
 0x105   : > { %v1361_v1 = vmul.bf16 3216621497, %v2002_v62  ;;  %v1483_v2 = vpop.f32.mrb[12].mxu0  ;;  %1631 = vrcp.bf16 %v699_v63 }
 0x106   : > { %1633 = vpow.bf16 %v1362_v0  ;;  %v540_v3 = vpop.f32.mrb[13].mxu0  ;;  %v549_v5 = vadd.f32 %v1483_v2, %v1974_v26 }
 0x107   : > { %1635 = vpow.bf16 %v1361_v1  ;;  %v1484_v4 = vpop.f32.mrb[14].mxu0  ;;  %v541_v9 = vadd.f32 %v1974_v26, %v540_v3 }
 0x108   : > { %v552_v6 = vadd.f32 %v1484_v4, %v1974_v26  ;;  %v543_v7 = vpop.f32.mrb[15].mxu0 }
 0x109   : > { %v1626_v8 = vpop.eup %1625  ;;  %v544_v10 = vadd.f32 %v1974_v26, %v543_v7 }
 0x10a   : > { %v1628_v11 = vpop.eup %1627  ;;  %v702_v12 = vadd.bf16 1065369472, %v1626_v8  ;;  %v2010_v13 = vpack.c.bf16 %v552_v6, %v549_v5 }
 0x10b   : > { %v701_v14 = vadd.bf16 1065369472, %v1628_v11  ;;  %v2012_v15 = vpack.c.bf16 %v544_v10, %v541_v9 }
 0x10c   : > { %1637 = vrcp.bf16 %v702_v12  ;;  %v1364_v16 = vmul.bf16 3216621497, %v2010_v13 }
 0x10d   : > { %1639 = vrcp.bf16 %v701_v14  ;;  %v1363_v17 = vmul.bf16 3216621497, %v2012_v15  ;;  %v1487_v18 = vpop.f32.mrb[16].mxu0 }
 0x10e   : > { %1641 = vpow.bf16 %v1364_v16  ;;  %v556_v19 = vpop.f32.mrb[17].mxu0  ;;  %v565_v23 = vadd.f32 %v1487_v18, %v1974_v26 }
 0x10f   : > { %v1630_v20 = vpop.eup %1629  ;;  %1643 = vpow.bf16 %v1363_v17  ;;  %v1488_v21 = vpop.f32.mrb[18].mxu0  ;;  %v557_v29 = vadd.f32 %v1974_v26, %v556_v19 }
 0x110   : > { %v1632_v22 = vpop.eup %1631  ;;  %v568_v24 = vadd.f32 %v1488_v21, %v1974_v26  ;;  %v559_v25 = vpop.f32.mrb[19].mxu0  ;;  %v718_v27 = vmul.bf16 1065369472, %v1630_v20 }
 0x111   : > { %v1634_v28 = vpop.eup %1633  ;;  %v560_v30 = vadd.f32 %v1974_v26, %v559_v25  ;;  %v716_v31 = vmul.bf16 1065369472, %v1632_v22 }
 0x112   : > { %v1636_v32 = vpop.eup %1635  ;;  %v704_v33 = vadd.bf16 1065369472, %v1634_v28  ;;  %v2020_v36 = vpack.c.bf16 %v568_v24, %v565_v23  ;;  %v748_v41 = vmul.bf16 %v718_v27, %v1980_v34 }
 0x113   : > { %v703_v37 = vadd.bf16 1065369472, %v1636_v32  ;;  %v2022_v38 = vpack.c.bf16 %v560_v30, %v557_v29  ;;  %v747_v39 = vmul.bf16 %v716_v31, %v1982_v35 }
 0x114   : > { %1645 = vrcp.bf16 %v704_v33  ;;  %v1366_v40 = vmul.bf16 3216621497, %v2020_v36 }
 0x115   : > { %1647 = vrcp.bf16 %v703_v37  ;;  %v1365_v42 = vmul.bf16 3216621497, %v2022_v38  ;;  %v1491_v43 = vpop.f32.mrb[20].mxu0  ;;  %1517 = vmatprep.mubr.bf16.mxu1 %v747_v39 }
 0x116   : > { %1649 = vpow.bf16 %v1366_v40  ;;  %v581_v44 = vadd.f32 %v1491_v43, %v1974_v26  ;;  %v572_v45 = vpop.f32.mrb[21].mxu0  ;;  %1518 = vmatmul.mubr.bf16.vlgmr.msra.gmra.mrb[0].mxu1 %v748_v41 }
 0x117   : > { %v1638_v48 = vpop.eup %1637  ;;  %1651 = vpow.bf16 %v1365_v42  ;;  %v573_v49 = vadd.f32 %v1974_v26, %v572_v45  ;;  %v1492_v35 = vpop.f32.mrb[22].mxu0 }
 0x118   : > { %v1640_v50 = vpop.eup %1639  ;;  %v584_v51 = vadd.f32 %v1492_v35, %v1974_v26  ;;  %v575_v52 = vpop.f32.mrb[23].mxu0  ;;  %v722_v34 = vmul.bf16 1065369472, %v1638_v48 }
 0x119   : > { %v1642_v53 = vpop.eup %1641  ;;  %v576_v54 = vadd.f32 %v1974_v26, %v575_v52  ;;  %v720_v55 = vmul.bf16 1065369472, %v1640_v50 }
 0x11a   : > { %v1644_v56 = vpop.eup %1643  ;;  %v706_v57 = vadd.bf16 1065369472, %v1642_v53  ;;  %v2032_v58 = vpack.c.bf16 %v584_v51, %v581_v44  ;;  %v750_v1 = vmul.bf16 %v722_v34, %v1990_v46 }
 0x11b   : > { %v705_v59 = vadd.bf16 1065369472, %v1644_v56  ;;  %v2034_v60 = vpack.c.bf16 %v576_v54, %v573_v49  ;;  %v749_v63 = vmul.bf16 %v720_v55, %v1992_v47 }
 0x11c   : > { %1653 = vrcp.bf16 %v706_v57  ;;  %v1368_v0 = vmul.bf16 3216621497, %v2032_v58 }
 0x11d   : > { %1655 = vrcp.bf16 %v705_v59  ;;  %v1367_v2 = vmul.bf16 3216621497, %v2034_v60  ;;  %v1495_v3 = vpop.f32.mrb[24].mxu0  ;;  %1521 = vmatprep.mubr.bf16.mxu1 %v749_v63 }
 0x11e   : > { %1657 = vpow.bf16 %v1368_v0  ;;  %v597_v4 = vadd.f32 %v1495_v3, %v1974_v26  ;;  %v588_v5 = vpop.f32.mrb[25].mxu0  ;;  %1522 = vmatmul.mubr.bf16.gmra.mrb[4].mxu1 %v750_v1 }
 0x11f   : > { %v1646_v6 = vpop.eup %1645  ;;  %1659 = vpow.bf16 %v1367_v2  ;;  %v589_v7 = vadd.f32 %v1974_v26, %v588_v5  ;;  %v1496_v47 = vpop.f32.mrb[26].mxu0 }
 0x120   : > { %v1648_v8 = vpop.eup %1647  ;;  %v600_v9 = vadd.f32 %v1496_v47, %v1974_v26  ;;  %v591_v10 = vpop.f32.mrb[27].mxu0  ;;  %v726_v46 = vmul.bf16 1065369472, %v1646_v6 }
 0x121   : > { %v1650_v11 = vpop.eup %1649  ;;  %v592_v12 = vadd.f32 %v1974_v26, %v591_v10  ;;  %v724_v14 = vmul.bf16 1065369472, %v1648_v8 }
 0x122   : > { %v1652_v16 = vpop.eup %1651  ;;  %v708_v17 = vadd.bf16 1065369472, %v1650_v11  ;;  %v2044_v18 = vpack.c.bf16 %v600_v9, %v597_v4  ;;  %v752_v23 = vmul.bf16 %v726_v46, %v2000_v61 }
 0x123   : > { %v707_v19 = vadd.bf16 1065369472, %v1652_v16  ;;  %v2046_v20 = vpack.c.bf16 %v592_v12, %v589_v7  ;;  %v751_v21 = vmul.bf16 %v724_v14, %v2002_v62  ;;  %v2067_v16 = vld [vmem:[%s2245_s4] ss:$0 sm:$0xff] }
 0x124   : > { %1661 = vrcp.bf16 %v708_v17  ;;  %v1370_v22 = vmul.bf16 3216621497, %v2044_v18 }
 0x125   : > { %1663 = vrcp.bf16 %v707_v19  ;;  %v1369_v24 = vmul.bf16 3216621497, %v2046_v20  ;;  %v1499_v25 = vpop.f32.mrb[28].mxu0  ;;  %1525 = vmatprep.mubr.bf16.mxu1 %v751_v21 }
 0x126   : > { %1665 = vpow.bf16 %v1370_v22  ;;  %v613_v27 = vadd.f32 %v1499_v25, %v1974_v26  ;;  %v604_v28 = vpop.f32.mrb[29].mxu0  ;;  %1526 = vmatmul.mubr.bf16.gmra.mrb[8].mxu1 %v752_v23 }
 0x127   : > { %v1654_v29 = vpop.eup %1653  ;;  %1667 = vpow.bf16 %v1369_v24  ;;  %v605_v30 = vadd.f32 %v1974_v26, %v604_v28  ;;  %v1500_v62 = vpop.f32.mrb[30].mxu0 }
 0x128   : > { %v1656_v31 = vpop.eup %1655  ;;  %v616_v32 = vadd.f32 %v1500_v62, %v1974_v26  ;;  %v607_v33 = vpop.f32.mrb[31].mxu0  ;;  %v730_v61 = vmul.bf16 1065369472, %v1654_v29 }
 0x129   : > { %v1658_v37 = vpop.eup %1657  ;;  %v608_v39 = vadd.f32 %v1974_v26, %v607_v33  ;;  %v728_v40 = vmul.bf16 1065369472, %v1656_v31 }
 0x12a   : > { %v1660_v41 = vpop.eup %1659  ;;  %v710_v42 = vadd.bf16 1065369472, %v1658_v37  ;;  %v634_v43 = vpack.c.bf16 %v616_v32, %v613_v27  ;;  %v754_v35 = vmul.bf16 %v730_v61, %v2010_v13 }
 0x12b   : > { %v709_v44 = vadd.bf16 1065369472, %v1660_v41  ;;  %v633_v45 = vpack.c.bf16 %v608_v39, %v605_v30  ;;  %v753_v48 = vmul.bf16 %v728_v40, %v2012_v15  ;;  %v1143_v41 = vld [vmem:[%s2247_s6] sm:$0xff] }
 0x12c   : > { %1669 = vrcp.bf16 %v710_v42  ;;  %v1372_v49 = vmul.bf16 3216621497, %v634_v43 }
 0x12d   : > { %1671 = vrcp.bf16 %v709_v44  ;;  %v1371_v50 = vmul.bf16 3216621497, %v633_v45  ;;  %1529 = vmatprep.mubr.bf16.mxu1 %v753_v48  ;;  %v1145_v44 = vld [vmem:[%s2247_s6 + $0x10] sm:$0xff] }
 0x12e   : > { %1673 = vpow.bf16 %v1372_v49  ;;  %1530 = vmatmul.mubr.bf16.gmra.mrb[12].mxu1 %v754_v35 }
 0x12f   : > { %v1662_v51 = vpop.eup %1661  ;;  %1675 = vpow.bf16 %v1371_v50  ;;  %v1144_v50 = vld [vmem:[%s2247_s6 + $0x8] sm:$0xff] }
 0x130   : > { %v1664_v26 = vpop.eup %1663  ;;  %v734_v52 = vmul.bf16 1065369472, %v1662_v51  ;;  %v1146_v51 = vld [vmem:[%s2247_s6 + $0x18] sm:$0xff] }
 0x131   : > { %v1666_v34 = vpop.eup %1665  ;;  %v732_v53 = vmul.bf16 1065369472, %v1664_v26 }
 0x132   : > { %v1668_v54 = vpop.eup %1667  ;;  %v712_v55 = vadd.bf16 1065369472, %v1666_v34  ;;  %v756_v57 = vmul.bf16 %v734_v52, %v2020_v36 }
 0x133   : > { %v711_v56 = vadd.bf16 1065369472, %v1668_v54  ;;  %v755_v15 = vmul.bf16 %v732_v53, %v2022_v38 }
 0x134   : > { %1677 = vrcp.bf16 %v712_v55 }
 0x135   : > { %1679 = vrcp.bf16 %v711_v56  ;;  %1533 = vmatprep.mubr.bf16.mxu1 %v755_v15 }
 0x136   : > { %1534 = vmatmul.mubr.bf16.gmra.mrb[16].mxu1 %v756_v57 }
 0x137   : > { %v1670_v13 = vpop.eup %1669 }
 0x138   : > { %v1672_v59 = vpop.eup %1671  ;;  %v738_v63 = vmul.bf16 1065369472, %v1670_v13 }
 0x139   : > { %v1674_v0 = vpop.eup %1673  ;;  %v736_v1 = vmul.bf16 1065369472, %v1672_v59 }
 0x13a   : > { %v1676_v2 = vpop.eup %1675  ;;  %v714_v3 = vadd.bf16 1065369472, %v1674_v0  ;;  %v758_v6 = vmul.bf16 %v738_v63, %v2032_v58 }
 0x13b   : > { %v713_v4 = vadd.bf16 1065369472, %v1676_v2  ;;  %v757_v5 = vmul.bf16 %v736_v1, %v2034_v60 }
 0x13c   : > { %1681 = vrcp.bf16 %v714_v3 }
 0x13d   : > { %1683 = vrcp.bf16 %v713_v4  ;;  %1537 = vmatprep.mubr.bf16.mxu1 %v757_v5 }
 0x13e   : > { %1538 = vmatmul.mubr.bf16.gmra.mrb[20].mxu1 %v758_v6 }
 0x13f   : > { %v1678_v36 = vpop.eup %1677 }
 0x140   : > { %v1680_v38 = vpop.eup %1679  ;;  %v742_v7 = vmul.bf16 1065369472, %v1678_v36 }
 0x141   : > { %v740_v47 = vmul.bf16 1065369472, %v1680_v38 }
 0x142   : > { %v760_v9 = vmul.bf16 %v742_v7, %v2044_v18  ;;  %v2072_v18 = vld [vmem:[%s2246_s5] sm:$0xff]  }
 0x143   : > { %v759_v8 = vmul.bf16 %v740_v47, %v2046_v20  ;;  %1463 = vmatprep.mubr.bf16.mxu0 %v2072_v18 }
 0x145   : > { %1541 = vmatprep.mubr.bf16.mxu1 %v759_v8 }
 0x146   : > { %1542 = vmatmul.mubr.bf16.gmra.mrb[24].mxu1 %v760_v9 }
 0x147   : > { %v1682_v10 = vpop.eup %1681 }
 0x148   : > { %v1684_v46 = vpop.eup %1683  ;;  %v746_v11 = vmul.bf16 1065369472, %v1682_v10 }
 0x149   : > { %v744_v60 = vmul.bf16 1065369472, %v1684_v46 }
 0x14a   : > { %v762_v14 = vmul.bf16 %v746_v11, %v634_v43  ;;  %v1813_v43 = vmov 0  }
 0x14b   : > { %v761_v12 = vmul.bf16 %v744_v60, %v633_v45  ;;  %1592 = vset.pattern.permute.xlu0 %v1813_v43  ;;  %1593 = vset.pattern.permute.xlu1 %v1813_v43 }
 0x14c   : > { %1149 = vperm.xlu0 %1592, %v1143_v41   ;;  %1159 = vperm.xlu1 %1593, %v1145_v44  }
 0x14d   : > { %1545 = vmatprep.mubr.bf16.mxu1 %v761_v12 }
 0x14e   : > { %1546 = vmatmul.mubr.bf16.gmra.mrb[28].mxu1 %v762_v14 }
 0x150   : > { %1154 = vperm.xlu0 %1592, %v1144_v50   ;;  %1164 = vperm.xlu1 %1593, %v1146_v51  }
 0x1e9   : > { %v1519_v58 = vpop.f32.mrb[0].mxu1 }
 0x1ea   : > { %v868_v17 = vpop.f32.mrb[1].mxu1  ;;  %v877_v20 = vadd.f32 %v1519_v58, %v2067_v16 }
 0x1eb   : > { %v1520_v19 = vpop.f32.mrb[2].mxu1  ;;  %v869_v23 = vadd.f32 %v2067_v16, %v868_v17 }
 0x1ec   : > { %v880_v21 = vadd.f32 %v1520_v19, %v2067_v16  ;;  %v871_v22 = vpop.f32.mrb[3].mxu1 }
 0x1ed   : > { %v872_v24 = vadd.f32 %v2067_v16, %v871_v22 }
 0x1ee   : > { %v2079_v25 = vpack.c.bf16 %v880_v21, %v877_v20 }
 0x1ef   : > { %v2081_v27 = vpack.c.bf16 %v872_v24, %v869_v23 }
 0x1f0   : > { %v1383_v10 = vmul.bf16 3216621497, %v2079_v25 }
 0x1f1   : > { %v1523_v28 = vpop.f32.mrb[4].mxu1  ;;  %v1382_v2 = vmul.bf16 3216621497, %v2081_v27 }
 0x1f2   : > { %v884_v29 = vpop.f32.mrb[5].mxu1  ;;  %v893_v62 = vadd.f32 %v1523_v28, %v2067_v16 }
 0x1f3   : > { %v1524_v30 = vpop.f32.mrb[6].mxu1  ;;  %v885_v33 = vadd.f32 %v2067_v16, %v884_v29  ;;  %1685 = vpow.bf16 %v1382_v2 }
 0x1f4   : > { %v896_v31 = vadd.f32 %v1524_v30, %v2067_v16  ;;  %v887_v32 = vpop.f32.mrb[7].mxu1 }
 0x1f5   : > { %v888_v61 = vadd.f32 %v2067_v16, %v887_v32 }
 0x1f6   : > { %v2087_v37 = vpack.c.bf16 %v896_v31, %v893_v62 }
 0x1f7   : > { %v2089_v39 = vpack.c.bf16 %v888_v61, %v885_v33 }
 0x1f9   : > { %v1527_v40 = vpop.f32.mrb[8].mxu1  ;;  %v1384_v28 = vmul.bf16 3216621497, %v2089_v39 }
 0x1fa   : > { %v900_v42 = vpop.f32.mrb[9].mxu1  ;;  %v909_v48 = vadd.f32 %v1527_v40, %v2067_v16 }
 0x1fb   : > { %v1528_v45 = vpop.f32.mrb[10].mxu1  ;;  %v901_v26 = vadd.f32 %v2067_v16, %v900_v42 }
 0x1fc   : > { %v912_v49 = vadd.f32 %v1528_v45, %v2067_v16  ;;  %v903_v35 = vpop.f32.mrb[11].mxu1 }
 0x1fd   : > { %v904_v52 = vadd.f32 %v2067_v16, %v903_v35 }
 0x1fe   : > { %v2107_v34 = vpack.c.bf16 %v912_v49, %v909_v48  ;;  %v1686_v23 = vpop.eup %1685 }
 0x1ff   : > { %v2109_v53 = vpack.c.bf16 %v904_v52, %v901_v26  ;;  %v1075_v31 = vadd.bf16 1065369472, %v1686_v23  ;;  %v1385_v26 = vmul.bf16 3216621497, %v2087_v37 }
 0x200   : > { %v1387_v23 = vmul.bf16 3216621497, %v2107_v34 }
 0x201   : > { %v1531_v54 = vpop.f32.mrb[12].mxu1 }
 0x202   : > { %v916_v55 = vpop.f32.mrb[13].mxu1  ;;  %v925_v15 = vadd.f32 %v1531_v54, %v2067_v16 }
 0x203   : > { %v1532_v56 = vpop.f32.mrb[14].mxu1  ;;  %v917_v59 = vadd.f32 %v2067_v16, %v916_v55 }
 0x204   : > { %v928_v57 = vadd.f32 %v1532_v56, %v2067_v16  ;;  %v919_v13 = vpop.f32.mrb[15].mxu1 }
 0x205   : > { %v920_v63 = vadd.f32 %v2067_v16, %v919_v13 }
 0x206   : > { %v2115_v0 = vpack.c.bf16 %v928_v57, %v925_v15 }
 0x207   : > { %v2117_v1 = vpack.c.bf16 %v920_v63, %v917_v59 }
 0x209   : > { %v1535_v3 = vpop.f32.mrb[16].mxu1 }
 0x20a   : > { %v932_v4 = vpop.f32.mrb[17].mxu1  ;;  %v941_v6 = vadd.f32 %v1535_v3, %v2067_v16 }
 0x20b   : > { %v1536_v5 = vpop.f32.mrb[18].mxu1  ;;  %v933_v7 = vadd.f32 %v2067_v16, %v932_v4 }
 0x20c   : > { %v944_v36 = vadd.f32 %v1536_v5, %v2067_v16  ;;  %v935_v38 = vpop.f32.mrb[19].mxu1 }
 0x20d   : > { %v936_v47 = vadd.f32 %v2067_v16, %v935_v38 }
 0x20e   : > { %v2124_v8 = vpack.c.bf16 %v944_v36, %v941_v6 }
 0x20f   : > { %v2126_v9 = vpack.c.bf16 %v936_v47, %v933_v7  ;;  %v1386_v7 = vmul.bf16 3216621497, %v2109_v53 }
 0x210   : > { %v1391_v46 = vmul.bf16 3216621497, %v2124_v8 }
 0x211   : > { %v1390_v11 = vmul.bf16 3216621497, %v2126_v9  ;;  %v1539_v60 = vpop.f32.mrb[20].mxu1 }
 0x212   : > { %1687 = vpow.bf16 %v1391_v46  ;;  %v948_v12 = vpop.f32.mrb[21].mxu1  ;;  %v957_v58 = vadd.f32 %v1539_v60, %v2067_v16 }
 0x213   : > { %1689 = vpow.bf16 %v1390_v11  ;;  %v1540_v14 = vpop.f32.mrb[22].mxu1  ;;  %v949_v20 = vadd.f32 %v2067_v16, %v948_v12 }
 0x214   : > { %1691 = vpow.bf16 %v1383_v10  ;;  %v960_v17 = vadd.f32 %v1540_v14, %v2067_v16  ;;  %v951_v19 = vpop.f32.mrb[23].mxu1 }
 0x215   : > { %v952_v21 = vadd.f32 %v2067_v16, %v951_v19 }
 0x216   : > { %v2135_v22 = vpack.c.bf16 %v960_v17, %v957_v58 }
 0x217   : > { %v2137_v24 = vpack.c.bf16 %v952_v21, %v949_v20 }
 0x218   : > { %v1393_v29 = vmul.bf16 3216621497, %v2135_v22 }
 0x219   : > { %v1392_v30 = vmul.bf16 3216621497, %v2137_v24  ;;  %v1543_v62 = vpop.f32.mrb[24].mxu1 }
 0x21a   : > { %v964_v32 = vpop.f32.mrb[25].mxu1  ;;  %v973_v61 = vadd.f32 %v1543_v62, %v2067_v16 }
 0x21b   : > { %1693 = vpow.bf16 %v1392_v30  ;;  %v1544_v33 = vpop.f32.mrb[26].mxu1  ;;  %v965_v43 = vadd.f32 %v2067_v16, %v964_v32 }
 0x21c   : > { %1695 = vpow.bf16 %v1384_v28  ;;  %v976_v40 = vadd.f32 %v1544_v33, %v2067_v16  ;;  %v967_v41 = vpop.f32.mrb[27].mxu1 }
 0x21d   : > { %v1688_v42 = vpop.eup %1687  ;;  %1697 = vpow.bf16 %v1393_v29  ;;  %v968_v44 = vadd.f32 %v2067_v16, %v967_v41  ;;  %v1388_v41 = vmul.bf16 3216621497, %v2117_v1 }
 0x21e   : > { %v1690_v45 = vpop.eup %1689  ;;  %1699 = vrcp.bf16 %v1075_v31  ;;  %v1084_v48 = vadd.bf16 1065369472, %v1688_v42  ;;  %v2146_v49 = vpack.c.bf16 %v976_v40, %v973_v61 }
 0x21f   : > { %v1692_v35 = vpop.eup %1691  ;;  %v1083_v50 = vadd.bf16 1065369472, %v1690_v45  ;;  %v2148_v51 = vpack.c.bf16 %v968_v44, %v965_v43 }
 0x220   : > { %1701 = vrcp.bf16 %v1084_v48  ;;  %v1076_v55 = vadd.bf16 1065369472, %v1692_v35  ;;  %v1395_v10 = vmul.bf16 3216621497, %v2146_v49 }
 0x221   : > { %1703 = vrcp.bf16 %v1083_v50  ;;  %v1394_v52 = vmul.bf16 3216621497, %v2148_v51  ;;  %v1547_v54 = vpop.f32.mrb[28].mxu1 }
 0x222   : > { %v980_v56 = vpop.f32.mrb[29].mxu1  ;;  %1705 = vpow.bf16 %v1385_v26  ;;  %v989_v57 = vadd.f32 %v1547_v54, %v2067_v16  ;;  %v1389_v54 = vmul.bf16 3216621497, %v2115_v0 }
 0x223   : > { %v1548_v15 = vpop.f32.mrb[30].mxu1  ;;  %1707 = vpow.bf16 %v1394_v52  ;;  %v981_v63 = vadd.f32 %v2067_v16, %v980_v56 }
 0x224   : > { %v992_v13 = vadd.f32 %v1548_v15, %v2067_v16  ;;  %v983_v59 = vpop.f32.mrb[31].mxu1  ;;  %1709 = vrcp.bf16 %v1076_v55 }
 0x225   : > { %v984_v2 = vadd.f32 %v2067_v16, %v983_v59 }
 0x226   : > { %v1694_v3 = vpop.eup %1693  ;;  %v2156_v4 = vpack.c.bf16 %v992_v13, %v989_v57 }
 0x227   : > { %v1696_v5 = vpop.eup %1695  ;;  %v1085_v6 = vadd.bf16 1065369472, %v1694_v3  ;;  %v2158_v36 = vpack.c.bf16 %v984_v2, %v981_v63 }
 0x228   : > { %v1698_v38 = vpop.eup %1697  ;;  %v1077_v46 = vadd.bf16 1065369472, %v1696_v5 }
 0x229   : > { %v1700_v47 = vpop.eup %1699  ;;  %1711 = vrcp.bf16 %v1085_v6  ;;  %v1086_v60 = vadd.bf16 1065369472, %v1698_v38  ;;  %v1396_v29 = vmul.bf16 3216621497, %v2158_v36 }
 0x22a   : > { %v1092_v16 = vmul.bf16 1065369472, %v1700_v47  ;;  %1713 = vpow.bf16 %v1386_v7 }
 0x22b   : > { %v1702_v11 = vpop.eup %1701  ;;  %1715 = vpow.bf16 %v1395_v10 }
 0x22c   : > { %v1704_v12 = vpop.eup %1703  ;;  %v1110_v58 = vmul.bf16 1065369472, %v1702_v11  ;;  %1717 = vrcp.bf16 %v1077_v46  ;;  %v1123_v21 = vmul.bf16 %v1092_v16, %v2081_v27 }
 0x22d   : > { %v1108_v14 = vmul.bf16 1065369472, %v1704_v12  ;;  %v1706_v17 = vpop.eup %1705  ;;  %1719 = vrcp.bf16 %v1086_v60 }
 0x22e   : > { %v1708_v20 = vpop.eup %1707  ;;  %v1132_v30 = vmul.bf16 %v1110_v58, %v2124_v8  ;;  %v1078_v62 = vadd.bf16 1065369472, %v1706_v17  ;;  %1721 = vpow.bf16 %v1387_v23  ;;  %v1397_v8 = vmul.bf16 3216621497, %v2156_v4 }
 0x22f   : > { %v1131_v19 = vmul.bf16 %v1108_v14, %v2126_v9  ;;  %v1710_v28 = vpop.eup %1709  ;;  %v1087_v31 = vadd.bf16 1065369472, %v1708_v20  ;;  %1723 = vpow.bf16 %v1396_v29  ;;  %v1150_v29 = vpop.permute.xlu0 %1149 }
 0x230   : > { %v1094_v33 = vmul.bf16 1065369472, %v1710_v28  ;;  %1725 = vrcp.bf16 %v1078_v62 }
 0x231   : > { %1447 = vmatprep.subr.bf16.mxu0 %v1131_v19  ;;  %1727 = vrcp.bf16 %v1087_v31 }
 0x232   : > { %1448 = vmatpush3.bf16.xpose.msra.mxu0 %v1123_v21  ;;  %v1124_v40 = vmul.bf16 %v1094_v33, %v2079_v25  ;;  %1729 = vpow.bf16 %v1388_v41 }
 0x233   : > { %1449 = vmatprep.subr.bf16.mxu0 %v1132_v30  ;;  %1731 = vpow.bf16 %v1397_v8 }
 0x234   : > { %v1712_v32 = vpop.eup %1711 }
 0x235   : > { %v1112_v9 = vmul.bf16 1065369472, %v1712_v32  ;;  %v1714_v61 = vpop.eup %1713 }
 0x236   : > { %v1716_v27 = vpop.eup %1715  ;;  %v1079_v45 = vadd.bf16 1065369472, %v1714_v61 }
 0x237   : > { %v1718_v42 = vpop.eup %1717  ;;  %v1133_v43 = vmul.bf16 %v1112_v9, %v2137_v24  ;;  %v1088_v48 = vadd.bf16 1065369472, %v1716_v27 }
 0x238   : > { %v1720_v44 = vpop.eup %1719  ;;  %v1096_v35 = vmul.bf16 1065369472, %v1718_v42  ;;  %1733 = vrcp.bf16 %v1079_v45 }
 0x239   : > { %v1114_v50 = vmul.bf16 1065369472, %v1720_v44  ;;  %v1722_v26 = vpop.eup %1721  ;;  %1735 = vrcp.bf16 %v1088_v48 }
 0x23a   : > { %1450 = vmatpush3.bf16.xpose.msra.mxu0 %v1124_v40  ;;  %v1724_v25 = vpop.eup %1723  ;;  %v1125_v52 = vmul.bf16 %v1096_v35, %v2089_v39  ;;  %v1080_v15 = vadd.bf16 1065369472, %v1722_v26  ;;  %1737 = vpow.bf16 %v1389_v54 }
 0x23b   : > { %1451 = vmatprep.subr.bf16.mxu0 %v1133_v43  ;;  %v1726_v55 = vpop.eup %1725  ;;  %v1134_v24 = vmul.bf16 %v1114_v50, %v2135_v22  ;;  %v1089_v57 = vadd.bf16 1065369472, %v1724_v25 }
 0x23c   : > { %v1728_v56 = vpop.eup %1727  ;;  %v1098_v13 = vmul.bf16 1065369472, %v1726_v55  ;;  %1739 = vrcp.bf16 %v1080_v15 }
 0x23d   : > { %v1116_v59 = vmul.bf16 1065369472, %v1728_v56  ;;  %v1730_v63 = vpop.eup %1729  ;;  %1741 = vrcp.bf16 %v1089_v57 }
 0x23e   : > { %v1732_v2 = vpop.eup %1731  ;;  %v1126_v3 = vmul.bf16 %v1098_v13, %v2087_v37  ;;  %v1081_v38 = vadd.bf16 1065369472, %v1730_v63 }
 0x23f   : > { %v1135_v5 = vmul.bf16 %v1116_v59, %v2148_v51  ;;  %v1090_v22 = vadd.bf16 1065369472, %v1732_v2 }
 0x240   : > { %1743 = vrcp.bf16 %v1081_v38 }
 0x241   : > { %1745 = vrcp.bf16 %v1090_v22 }
 0x242   : > { %1452 = vmatpush3.bf16.xpose.msra.mxu0 %v1125_v52 }
 0x243   : > { %1453 = vmatprep.subr.bf16.mxu0 %v1134_v24  ;;  %v1734_v39 = vpop.eup %1733 }
 0x244   : > { %v1736_v6 = vpop.eup %1735  ;;  %v1100_v7 = vmul.bf16 1065369472, %v1734_v39 }
 0x245   : > { %v1118_v47 = vmul.bf16 1065369472, %v1736_v6  ;;  %v1738_v10 = vpop.eup %1737 }
 0x246   : > { %v1127_v46 = vmul.bf16 %v1100_v7, %v2109_v53  ;;  %v1082_v37 = vadd.bf16 1065369472, %v1738_v10 }
 0x247   : > { %v1740_v11 = vpop.eup %1739  ;;  %v1136_v60 = vmul.bf16 %v1118_v47, %v2146_v49 }
 0x248   : > { %v1742_v12 = vpop.eup %1741  ;;  %v1102_v51 = vmul.bf16 1065369472, %v1740_v11  ;;  %1747 = vrcp.bf16 %v1082_v37 }
 0x249   : > { %v1120_v16 = vmul.bf16 1065369472, %v1742_v12 }
 0x24a   : > { %1454 = vmatpush3.bf16.xpose.msra.mxu0 %v1126_v3  ;;  %v1128_v14 = vmul.bf16 %v1102_v51, %v2107_v34 }
 0x24b   : > { %1455 = vmatprep.subr.bf16.mxu0 %v1135_v5  ;;  %v1744_v58 = vpop.eup %1743  ;;  %v1137_v17 = vmul.bf16 %v1120_v16, %v2158_v36  ;;  %v1620_v36 = vld [vmem:[%s2246_s5 + $0x8] sm:$0xff]  }
 0x24c   : > { %v1746_v19 = vpop.eup %1745  ;;  %v1104_v53 = vmul.bf16 1065369472, %v1744_v58 }
 0x24d   : > { %v1122_v20 = vmul.bf16 1065369472, %v1746_v19 }
 0x24e   : > { %v1129_v49 = vmul.bf16 %v1104_v53, %v2117_v1 }
 0x24f   : > { %v1138_v23 = vmul.bf16 %v1122_v20, %v2156_v4  ;;  %v1155_v4 = vpop.permute.xlu0 %1154 }
 0x252   : > { %1456 = vmatpush3.bf16.xpose.msra.mxu0 %v1127_v46 }
 0x253   : > { %1457 = vmatprep.subr.bf16.mxu0 %v1136_v60  ;;  %v1748_v21 = vpop.eup %1747 }
 0x254   : > { %v1106_v28 = vmul.bf16 1065369472, %v1748_v21 }
 0x256   : > { %v1130_v34 = vmul.bf16 %v1106_v28, %v2115_v0 }
 0x25a   : > { %1458 = vmatpush3.bf16.xpose.msra.mxu0 %v1128_v14 }
 0x25b   : > { %1459 = vmatprep.subr.bf16.mxu0 %v1137_v17 }
 0x262   : > { %1460 = vmatpush3.bf16.xpose.msra.mxu0 %v1129_v49 }
 0x263   : > { %1461 = vmatprep.subr.bf16.mxu0 %v1138_v23 }
 0x26a   : > { %1462 = vmatpush3.bf16.xpose.msra.mxu0 %v1130_v34 }
 0x271   : > { %1464 = vmatmul.mubr.bf16.vlgmr.msra.gmra.mrb[32].mxu0 %v2072_v18  ;;  %v1160_v18 = vpop.permute.xlu1 %1159 }
 0x272   : > { %1465 = vmatprep.mubr.bf16.mxu0 %v1620_v36 }
 0x275   : > { %v1165_v41 = vpop.permute.xlu1 %1164 }
 0x279   : > { %1466 = vmatmul.mubr.bf16.gmra.mrb[36].mxu0 %v1620_v36 }
 0x344   : > { %v1213_v1 = vpop.f32.mrb[32].mxu0 }
 0x345   : > { %v1214_v30 = vadd.f32 %v1213_v1, %v1150_v29  ;;  %v1215_v62 = vpop.f32.mrb[33].mxu0 }
 0x346   : > { %v1216_v31 = vadd.f32 %v1215_v62, %v1150_v29  ;;  %v1217_v0 = vpop.f32.mrb[34].mxu0 }
 0x347   : > { %1232 = vst [vmem:[%s272_s9] sm:$0xff] %v1214_v30  ;;  %v1218_v32 = vadd.f32 %v1217_v0, %v1155_v4  ;;  %v1219_v33 = vpop.f32.mrb[35].mxu0 }
 0x348   : > { %1233 = vst [vmem:[%s272_s9 + $0x8] sm:$0xff] %v1216_v31  ;;  %v1220_v9 = vadd.f32 %v1219_v33, %v1155_v4 }
 0x349   : > { %1234 = vst [vmem:[%s272_s9 + $0x10] sm:$0xff] %v1218_v32 }
 0x34a   : > { %1235 = vst [vmem:[%s272_s9 + $0x18] sm:$0xff] %v1220_v9 }
 0x34c   : > { %v1223_v61 = vpop.f32.mrb[36].mxu0 }
 0x34d   : > { %v1224_v27 = vadd.f32 %v1223_v61, %v1160_v18  ;;  %v1225_v40 = vpop.f32.mrb[37].mxu0 }
 0x34e   : > { %v1226_v42 = vadd.f32 %v1225_v40, %v1160_v18  ;;  %v1227_v8 = vpop.f32.mrb[38].mxu0 }
 0x34f   : > { %1236 = vst [vmem:[%s272_s9 + $0x20] sm:$0xff] %v1224_v27  ;;  %v1228_v43 = vadd.f32 %v1227_v8, %v1165_v41  ;;  %v1229_v44 = vpop.f32.mrb[39].mxu0 }
 0x350   : > { %1237 = vst [vmem:[%s272_s9 + $0x28] sm:$0xff] %v1226_v42  ;;  %v1230_v45 = vadd.f32 %v1229_v44, %v1165_v41 }
 0x351   : > { %1238 = vst [vmem:[%s272_s9 + $0x30] sm:$0xff] %v1228_v43 }
 0x352   : > { %1239 = vst [vmem:[%s272_s9 + $0x38] sm:$0xff] %v1230_v45 }
 0x353   : > { %1762 = shalt.err (!%p1759_p3)
}
 0x354   : > { %s1763_s22 = scalar_lea.hbm %s2196_s17, 1024  ;;  %s1767_s8 = scalar_lea.hbm %s2248_s7, 2048 }
 0x355   : > { %p1764_p4 = scmp.ne.s32.totalorder %s2196_s17, %s1763_s22  ;;  %p1768_p9 = scmp.lt.u32.totalorder %s2196_s17, %s2248_s7 }
 0x356   : > { %p1769_p10 = scmp.lt.u32.totalorder %s1767_s8, %s1763_s22  ;;  %p1771_p12 = scmp.lt.u32.totalorder %s1763_s22, %s2196_s17 }
 0x357   : > { %p1765_p7 = pnand %p1764_p4, %p1896_p5 }
 0x358   : > { %p1770_p11 = por %p1769_p10, %p1768_p9 }
 0x359   : > { %p1766_p8 = pneg %p1765_p7 }
 0x35a   : > { %p1772_p13 = por %p1771_p12, %p1770_p11 }
 0x35c   : > { %p1773_p0 = pnand %p1772_p13, %p1766_p8 }
 0x35e   : > { %1776 = shalt.err (!%p1773_p0)
}
 0x35f   : > { %s1815_s15 = smov 256   ;;  %s1816_s16 = smov 512  }
 0x360   : > { %s1817_s18 = smov 16  }
 0x361   : > { %1549 = dma.vmem_to_hbm [thread:$0]  (%p1896_p5), %s2191_s13, 1024, %s2196_s17, %s2200_s28, %s1815_s15, %s1816_s16, %s1817_s18  }
 0x362 PF: > { %p1555_p1 = scmp.ge.s32.totalorder %s1811_s27, 2  ;;  %s1269_s19 = sand.u32 1, %s1799_s24  }
 0x363   : > { %s1270_s20 = scalar_lea.sflag [#allocation3], %s1269_s19 }
 0x364   : > { %p1552_p2 = pnand %p1555_p1, %p1900_p6 }
 0x366   : > { %1794 = dma.done.wait (!%p1552_p2), %s1270_s20, 1024  }
 0x367   : > { %1796 = vsyncadd (!%p1552_p2), %s1270_s20, 4294966272  ;;  %p17_p3 = scmp.ge.s32.totalorder %s1883_s30, 4   ;;  %s2251_s24 = smov %s1803_s25 }
 0x368   : > { %s2252_s25 = smov %s1807_s26  ;;  %s2253_s26 = smov %s1894_s10 }
 0x369   : > { %s2254_s27 = smov %s1883_s30  ;;  %19 = sbr.rel (!%p17_p3) target bundleno = 3 (0x3), region = 83 }
 0x370   :  { %1275 = vsyncpa [#allocation3], 1 }
 0x371   :  { %1277 = vsyncpa [#allocation3 + $0x1], 1 }

</bundles_post_ra>
